<compile_context>
chip_gen: v7x
topology: tpu7x:2x2x1
jax: 0.10.0
libtpu: 0.0.40
codegen_flags: <defaults>
</compile_context>

<pallas_src>
import functools

import jax
import jax.numpy as jnp
from jax.experimental import pallas as pl
from jax.experimental.pallas import tpu as pltpu

HIDDEN = 32          # MLP width
NUM_FEATURES = 16    # geo-feature embedding size fed to the color head
LANE = 128
DEFAULT_TILE = 8192  # lanes per grid step (<=8192 keeps v5e scoped-VMEM happy)

# Packed weight-slab layout (bf16, (W_ROWS, 32)):
#   rows   0: 64  -> wx  : [w1^T (cols 0:3) ; w4d^T (cols 3:6)]
#   rows  64: 96  -> w2^T
#   rows  96:136  -> w34 : [(w3e.w4e)^T (32 rows) ; w3d^T (1 row) ; zero pad]
#   rows 136:144  -> w5^T (3 rows used)
W34_ROWS = HIDDEN + 8            # 40
W5_OFF = 3 * HIDDEN + W34_ROWS   # 136
W_ROWS = W5_OFF + 8              # 144
# Packed bias-slab layout (f32, (B_ROWS, 1)):
#   rows 0:32 b1 | 32:64 (b4 + b3e.w4e) | 64:96 b2 | 96 b3_density | 97:100 b5
B_ROWS = 3 * HIDDEN + 8          # 104


def field_kernel(x_ref, w_ref, b_ref, out_ref):
    H = HIDDEN
    x = x_ref[...]                                  # (6, TN) bf16: pos rows 0-2, dir rows 3-5
    W = w_ref[...]                                  # (144, 32) bf16 packed weights
    B = b_ref[...]                                  # (104, 1)  f32 packed biases

    wx = W[0:2 * H, 0:6]                            # fused [w1^T ; w4d^T]      (64, 6)
    w2 = W[2 * H:3 * H, :]                          # (32, 32)
    w34 = W[3 * H:3 * H + W34_ROWS, :]              # fused density/color head  (40, 32)
    w5 = W[W5_OFF:W5_OFF + 8, :]                    # rows 0:3 = w5^T            (8, 32)

    bx = B[0:2 * H, :]                              # [b1 ; b4 + b3e.w4e]
    b2 = B[2 * H:3 * H, :]
    bd = B[3 * H:3 * H + 1, :]                      # density bias b3[0]
    b5 = B[3 * H + 1:3 * H + 4, :]

    # Layer 1 + view-direction branch in one MXU pass (bf16 operands, f32 acc).
    hx = jnp.dot(wx, x, preferred_element_type=jnp.float32) + bx       # (64, TN) f32
    h1 = jnp.maximum(hx[0:H, :], 0.0).astype(jnp.bfloat16)             # (32, TN)
    c_dir = hx[H:2 * H, :]                                             # (32, TN) f32

    h2 = jnp.maximum(
        jnp.dot(w2, h1, preferred_element_type=jnp.float32) + b2, 0.0
    ).astype(jnp.bfloat16)                                             # (32, TN)

    # Fused density + (w3e.w4e) color-conditioning head: one (40,32) matmul.
    g = jnp.dot(w34, h2, preferred_element_type=jnp.float32)           # (40, TN) f32
    d_pre = g[H:H + 1, :] + bd                                         # (1, TN)
    c = jnp.maximum(g[0:H, :] + c_dir, 0.0).astype(jnp.bfloat16)       # (32, TN)

    rgb_pre = jnp.dot(w5, c, preferred_element_type=jnp.float32)[0:3, :] + b5

    # Single lane-dense (4, TN) output slab: row 0 density (stable softplus),
    # rows 1:3 rgb (sigmoid).  Elementwise math stays in f32 (v5e-safe).
    out_ref[0:1, :] = jnp.maximum(d_pre, 0.0) + jnp.log1p(jnp.exp(-jnp.abs(d_pre)))
    out_ref[1:4, :] = 1.0 / (1.0 + jnp.exp(-rgb_pre))


def make_params(key):
    ks = jax.random.split(key, 6)
    scale = 0.1
    return dict(
        w1=scale * jax.random.normal(ks[0], (3, HIDDEN), jnp.float32),
        b1=jnp.zeros((1, HIDDEN), jnp.float32),
        w2=scale * jax.random.normal(ks[1], (HIDDEN, HIDDEN), jnp.float32),
        b2=jnp.zeros((1, HIDDEN), jnp.float32),
        w3=scale * jax.random.normal(ks[2], (HIDDEN, 1 + NUM_FEATURES), jnp.float32),
        b3=jnp.zeros((1, 1 + NUM_FEATURES), jnp.float32),
        w4e=scale * jax.random.normal(ks[3], (NUM_FEATURES, HIDDEN), jnp.float32),
        w4d=scale * jax.random.normal(ks[4], (3, HIDDEN), jnp.float32),
        b4=jnp.zeros((1, HIDDEN), jnp.float32),
        w5=scale * jax.random.normal(ks[5], (HIDDEN, 3), jnp.float32),
        b5=jnp.zeros((1, 3), jnp.float32),
    )


def _pack_params(p):
    """Repack natural-orientation params into the kernel's fused bf16/f32 slabs."""
    H = HIDDEN
    w3d = p["w3"][:, 0:1]                       # (32, 1)  density column
    w3e = p["w3"][:, 1:]                        # (32, 16) embedding columns
    b3d = p["b3"][0, 0]                         # scalar density bias
    b3e = p["b3"][:, 1:]                        # (1, 16)
    wc = (w3e @ p["w4e"]).T                     # (32, 32) fused w3e.w4e (offline, f32)
    b4eff = (p["b4"] + b3e @ p["w4e"])[0]       # (32,)    b4 + b3e.w4e

    W = jnp.zeros((W_ROWS, H), jnp.float32)
    W = W.at[0:H, 0:3].set(p["w1"].T)           # layer-1 (positions)
    W = W.at[H:2 * H, 3:6].set(p["w4d"].T)      # direction branch of color head
    W = W.at[2 * H:3 * H, :].set(p["w2"].T)
    W = W.at[3 * H:4 * H, :].set(wc)            # fused color-conditioning rows
    W = W.at[4 * H, :].set(w3d[:, 0])           # density row
    W = W.at[W5_OFF:W5_OFF + 3, :].set(p["w5"].T)
    W = W.astype(jnp.bfloat16)                  # bf16 MXU operands (cast once)

    B = jnp.zeros((B_ROWS, 1), jnp.float32)
    B = B.at[0:H, 0].set(p["b1"][0])
    B = B.at[H:2 * H, 0].set(b4eff)
    B = B.at[2 * H:3 * H, 0].set(p["b2"][0])
    B = B.at[3 * H, 0].set(b3d)
    B = B.at[3 * H + 1:3 * H + 4, 0].set(p["b5"][0])
    return W, B


def _round_up(a, m):
    return -(-a // m) * m


@functools.partial(jax.jit, static_argnames=("tile_n",))
def field_forward(positions, directions, params, tile_n=None):
    """Field.forward: positions/directions (..., 3) -> {"rgb": (...,3), "density": (...,1)}."""
    batch_shape = positions.shape[:-1]
    pos = positions.reshape(-1, 3).astype(jnp.float32)
    dirs = directions.reshape(-1, 3).astype(jnp.float32)
    n = pos.shape[0]

    # Large lane tiles (amortize ~0.35us/step), but target >= 2 grid steps so the
    # "parallel" grid axis can be split across v7x's two TensorCores.
    if tile_n is None:
        tile_n = max(LANE, min(DEFAULT_TILE, _round_up(-(-n // 2), LANE)))
    else:
        tile_n = max(LANE, _round_up(tile_n, LANE))
    n_pad = _round_up(n, tile_n)

    # Channel-major input slab (6, n): pos rows 0-2, dir rows 3-5. bf16 (it is the
    # first matmul's operand anyway) -> half the input HBM traffic.
    x = jnp.concatenate([pos.T, dirs.T], axis=0)
    if n_pad != n:
        x = jnp.pad(x, ((0, 0), (0, n_pad - n)))
    x = x.astype(jnp.bfloat16)

    W, B = _pack_params(params)

    out = pl.pallas_call(
        field_kernel,
        out_shape=jax.ShapeDtypeStruct((4, n_pad), jnp.float32),
        grid_spec=pltpu.PrefetchScalarGridSpec(
            num_scalar_prefetch=0,
            grid=(n_pad // tile_n,),
            in_specs=[
                pl.BlockSpec((6, tile_n), lambda i: (0, i)),   # packed pos/dir
                pl.BlockSpec(W.shape, lambda i: (0, 0)),       # one weight slab
                pl.BlockSpec(B.shape, lambda i: (0, 0)),       # one bias slab
            ],
            out_specs=pl.BlockSpec((4, tile_n), lambda i: (0, i)),
        ),
        compiler_params=pltpu.CompilerParams(
            dimension_semantics=("parallel",),
            vmem_limit_bytes=32 * 1024 * 1024),
    )(x, W, B)

    density = out[0, :n].reshape(*batch_shape, 1)
    rgb = out[1:4, :n].T.reshape(*batch_shape, 3)
    # TODO(synk): callers that can consume channel-major (4, N) output directly
    # should take `out` as-is and skip this transpose (saves one HBM pass).
    return {"rgb": rgb, "density": density}


def reference_forward(positions, directions, params):
    pos = positions.reshape(-1, 3)
    dirs = directions.reshape(-1, 3)
    h = jax.nn.relu(pos @ params["w1"] + params["b1"])
    h = jax.nn.relu(h @ params["w2"] + params["b2"])
    geo = h @ params["w3"] + params["b3"]
    density = jax.nn.softplus(geo[:, :1])
    emb = geo[:, 1:]
    c = jax.nn.relu(emb @ params["w4e"] + dirs @ params["w4d"] + params["b4"])
    rgb = jax.nn.sigmoid(c @ params["w5"] + params["b5"])
    bs = positions.shape[:-1]
    return {"rgb": rgb.reshape(*bs, 3), "density": density.reshape(*bs, 1)}


if __name__ == "__main__":
    key = jax.random.PRNGKey(0)
    kp, kpos, kdir = jax.random.split(key, 3)
    params = make_params(kp)

    # bf16 matmul operands -> compare against f32 reference with loose tolerance.
    ATOL = 2e-2
    RTOL = 2e-2

    # Test 1: batch of 2 rays, 8 samples per ray -> (2, 8, 3), single grid step.
    positions = jax.random.uniform(kpos, (2, 8, 3), jnp.float32, -1.0, 1.0)
    directions = jax.random.normal(kdir, (2, 8, 3), jnp.float32)
    directions = directions / jnp.linalg.norm(directions, axis=-1, keepdims=True)

    out = field_forward(positions, directions, params)
    jax.block_until_ready(out)
    ref = reference_forward(positions, directions, params)
    assert out["density"].shape == (2, 8, 1)
    assert out["rgb"].shape == (2, 8, 3)
    assert jnp.allclose(out["density"], ref["density"], atol=ATOL, rtol=RTOL)
    assert jnp.allclose(out["rgb"], ref["rgb"], atol=ATOL, rtol=RTOL)

    # Test 2: non-multiple sample count, auto tile -> 2 grid steps (megacore path).
    k2p, k2d = jax.random.split(jax.random.PRNGKey(1))
    positions2 = jax.random.uniform(k2p, (3, 100, 3), jnp.float32, -1.0, 1.0)
    directions2 = jax.random.normal(k2d, (3, 100, 3), jnp.float32)
    directions2 = directions2 / jnp.linalg.norm(directions2, axis=-1, keepdims=True)

    out2 = field_forward(positions2, directions2, params)
    jax.block_until_ready(out2)
    ref2 = reference_forward(positions2, directions2, params)
    assert jnp.allclose(out2["density"], ref2["density"], atol=ATOL, rtol=RTOL)
    assert jnp.allclose(out2["rgb"], ref2["rgb"], atol=ATOL, rtol=RTOL)

    # Test 3: explicit small tile -> 3-step grid with lane padding.
    out3 = field_forward(positions2, directions2, params, tile_n=128)
    jax.block_until_ready(out3)
    assert jnp.allclose(out3["density"], ref2["density"], atol=ATOL, rtol=RTOL)
    assert jnp.allclose(out3["rgb"], ref2["rgb"], atol=ATOL, rtol=RTOL)

    print("KERNEL_OK")
</pallas_src>

<mosaic_0001>
module attributes {stable_mosaic.version = 11 : i64} {
  func.func @field_kernel(%arg0: i32, %arg1: memref<6x128xbf16, #tpu.memory_space<vmem>>, %arg2: memref<144x32xbf16, #tpu.memory_space<vmem>>, %arg3: memref<104x1xf32, #tpu.memory_space<vmem>>, %arg4: memref<4x128xf32, #tpu.memory_space<vmem>>) attributes {dimension_semantics = [#tpu.dimension_semantics<parallel>], iteration_bounds = array<i64: 1>, scalar_prefetch = 0 : i64, scratch_operands = 0 : i64, tpu.core_type = #tpu.core_type<tc>, window_params = [{transform_indices = @transform_0, window_bounds = array<i64: 6, 128>}, {pipeline_mode = #tpu.pipeline_mode<synchronous>, transform_indices = @transform_1, window_bounds = array<i64: 144, 32>}, {pipeline_mode = #tpu.pipeline_mode<synchronous>, transform_indices = @transform_2, window_bounds = array<i64: 104, 1>}, {transform_indices = @transform_3, window_bounds = array<i64: 4, 128>}]} {
    %c0 = arith.constant 0 : index
    %c0_0 = arith.constant 0 : index
    %0 = vector.load %arg1[%c0, %c0_0] : memref<6x128xbf16, #tpu.memory_space<vmem>>, vector<6x128xbf16>
    %c0_1 = arith.constant 0 : index
    %c0_2 = arith.constant 0 : index
    %1 = vector.load %arg2[%c0_1, %c0_2] : memref<144x32xbf16, #tpu.memory_space<vmem>>, vector<144x32xbf16>
    %c0_3 = arith.constant 0 : index
    %c0_4 = arith.constant 0 : index
    %2 = vector.load %arg3[%c0_3, %c0_4] : memref<104x1xf32, #tpu.memory_space<vmem>>, vector<104x1xf32>
    %3 = vector.extract_strided_slice %1 {offsets = [0, 0], sizes = [64, 6], strides = [1, 1]} : vector<144x32xbf16> to vector<64x6xbf16>
    %4 = vector.extract_strided_slice %1 {offsets = [64, 0], sizes = [32, 32], strides = [1, 1]} : vector<144x32xbf16> to vector<32x32xbf16>
    %5 = vector.extract_strided_slice %1 {offsets = [96, 0], sizes = [40, 32], strides = [1, 1]} : vector<144x32xbf16> to vector<40x32xbf16>
    %6 = vector.extract_strided_slice %1 {offsets = [136, 0], sizes = [8, 32], strides = [1, 1]} : vector<144x32xbf16> to vector<8x32xbf16>
    %7 = vector.extract_strided_slice %2 {offsets = [0, 0], sizes = [64, 1], strides = [1, 1]} : vector<104x1xf32> to vector<64x1xf32>
    %8 = vector.extract_strided_slice %2 {offsets = [64, 0], sizes = [32, 1], strides = [1, 1]} : vector<104x1xf32> to vector<32x1xf32>
    %9 = vector.extract_strided_slice %2 {offsets = [96, 0], sizes = [1, 1], strides = [1, 1]} : vector<104x1xf32> to vector<1x1xf32>
    %10 = vector.extract_strided_slice %2 {offsets = [97, 0], sizes = [3, 1], strides = [1, 1]} : vector<104x1xf32> to vector<3x1xf32>
    %cst = arith.constant dense<0.000000e+00> : vector<64x128xf32>
    %11 = tpu.matmul %3, %0, %cst {dimension_numbers = #tpu.dot_dimension_numbers<[1], [0], [0], [1], [0, 0, 1, 1], [], []>} : vector<64x6xbf16>, vector<6x128xbf16>, vector<64x128xf32> -> vector<64x128xf32>
    %12 = vector.broadcast %7 : vector<64x1xf32> to vector<64x128xf32>
    %13 = arith.addf %11, %12 : vector<64x128xf32>
    %14 = vector.extract_strided_slice %13 {offsets = [0, 0], sizes = [32, 128], strides = [1, 1]} : vector<64x128xf32> to vector<32x128xf32>
    %cst_5 = arith.constant 0.000000e+00 : f32
    %15 = vector.broadcast %cst_5 : f32 to vector<32x128xf32>
    %16 = arith.maximumf %14, %15 : vector<32x128xf32>
    %17 = arith.truncf %16 : vector<32x128xf32> to vector<32x128xbf16>
    %18 = vector.extract_strided_slice %13 {offsets = [32, 0], sizes = [32, 128], strides = [1, 1]} : vector<64x128xf32> to vector<32x128xf32>
    %cst_6 = arith.constant dense<0.000000e+00> : vector<32x128xf32>
    %19 = tpu.matmul %4, %17, %cst_6 {dimension_numbers = #tpu.dot_dimension_numbers<[1], [0], [0], [1], [0, 0, 1, 1], [], []>} : vector<32x32xbf16>, vector<32x128xbf16>, vector<32x128xf32> -> vector<32x128xf32>
    %20 = vector.broadcast %8 : vector<32x1xf32> to vector<32x128xf32>
    %21 = arith.addf %19, %20 : vector<32x128xf32>
    %cst_7 = arith.constant 0.000000e+00 : f32
    %22 = vector.broadcast %cst_7 : f32 to vector<32x128xf32>
    %23 = arith.maximumf %21, %22 : vector<32x128xf32>
    %24 = arith.truncf %23 : vector<32x128xf32> to vector<32x128xbf16>
    %cst_8 = arith.constant dense<0.000000e+00> : vector<40x128xf32>
    %25 = tpu.matmul %5, %24, %cst_8 {dimension_numbers = #tpu.dot_dimension_numbers<[1], [0], [0], [1], [0, 0, 1, 1], [], []>} : vector<40x32xbf16>, vector<32x128xbf16>, vector<40x128xf32> -> vector<40x128xf32>
    %26 = vector.extract_strided_slice %25 {offsets = [32, 0], sizes = [1, 128], strides = [1, 1]} : vector<40x128xf32> to vector<1x128xf32>
    %27 = vector.broadcast %9 : vector<1x1xf32> to vector<1x128xf32>
    %28 = arith.addf %26, %27 : vector<1x128xf32>
    %29 = vector.extract_strided_slice %25 {offsets = [0, 0], sizes = [32, 128], strides = [1, 1]} : vector<40x128xf32> to vector<32x128xf32>
    %30 = arith.addf %29, %18 : vector<32x128xf32>
    %cst_9 = arith.constant 0.000000e+00 : f32
    %31 = vector.broadcast %cst_9 : f32 to vector<32x128xf32>
    %32 = arith.maximumf %30, %31 : vector<32x128xf32>
    %33 = arith.truncf %32 : vector<32x128xf32> to vector<32x128xbf16>
    %cst_10 = arith.constant dense<0.000000e+00> : vector<8x128xf32>
    %34 = tpu.matmul %6, %33, %cst_10 {dimension_numbers = #tpu.dot_dimension_numbers<[1], [0], [0], [1], [0, 0, 1, 1], [], []>} : vector<8x32xbf16>, vector<32x128xbf16>, vector<8x128xf32> -> vector<8x128xf32>
    %35 = vector.extract_strided_slice %34 {offsets = [0, 0], sizes = [3, 128], strides = [1, 1]} : vector<8x128xf32> to vector<3x128xf32>
    %36 = vector.broadcast %10 : vector<3x1xf32> to vector<3x128xf32>
    %37 = arith.addf %35, %36 : vector<3x128xf32>
    %cst_11 = arith.constant 0.000000e+00 : f32
    %38 = vector.broadcast %cst_11 : f32 to vector<1x128xf32>
    %39 = arith.maximumf %28, %38 : vector<1x128xf32>
    %40 = math.absf %28 : vector<1x128xf32>
    %cst_12 = arith.constant 0.000000e+00 : f32
    %41 = vector.broadcast %cst_12 : f32 to vector<1x128xf32>
    %42 = arith.subf %41, %40 : vector<1x128xf32>
    %43 = math.exp %42 : vector<1x128xf32>
    %44 = math.log1p %43 : vector<1x128xf32>
    %45 = arith.addf %39, %44 : vector<1x128xf32>
    %c0_13 = arith.constant 0 : index
    %c0_14 = arith.constant 0 : index
    %46 = vector.load %arg4[%c0_13, %c0_14] : memref<4x128xf32, #tpu.memory_space<vmem>>, vector<1x128xf32>
    tpu.vector_store %arg4[%c0_13, %c0_14], %45 {strides = array<i32>} : memref<4x128xf32, #tpu.memory_space<vmem>>, vector<1x128xf32>,
    %cst_15 = arith.constant 0.000000e+00 : f32
    %47 = vector.broadcast %cst_15 : f32 to vector<3x128xf32>
    %48 = arith.subf %47, %37 : vector<3x128xf32>
    %49 = math.exp %48 : vector<3x128xf32>
    %cst_16 = arith.constant 1.000000e+00 : f32
    %50 = vector.broadcast %cst_16 : f32 to vector<3x128xf32>
    %51 = arith.addf %50, %49 : vector<3x128xf32>
    %cst_17 = arith.constant 1.000000e+00 : f32
    %52 = vector.broadcast %cst_17 : f32 to vector<3x128xf32>
    %53 = arith.divf %52, %51 : vector<3x128xf32>
    %c1 = arith.constant 1 : index
    %c0_18 = arith.constant 0 : index
    %54 = vector.load %arg4[%c1, %c0_18] : memref<4x128xf32, #tpu.memory_space<vmem>>, vector<3x128xf32>
    tpu.vector_store %arg4[%c1, %c0_18], %53 {strides = array<i32>} : memref<4x128xf32, #tpu.memory_space<vmem>>, vector<3x128xf32>,
    return
  }
  func.func @transform_0(%arg0: i32) -> (i32, i32) {
    %c0_i32 = arith.constant 0 : i32
    %c0_i32_0 = arith.constant 0 : i32
    return %c0_i32, %arg0 : i32, i32
  }
  func.func @transform_1(%arg0: i32) -> (i32, i32) {
    %c0_i32 = arith.constant 0 : i32
    %c0_i32_0 = arith.constant 0 : i32
    %c0_i32_1 = arith.constant 0 : i32
    return %c0_i32, %c0_i32_0 : i32, i32
  }
  func.func @transform_2(%arg0: i32) -> (i32, i32) {
    %c0_i32 = arith.constant 0 : i32
    %c0_i32_0 = arith.constant 0 : i32
    %c0_i32_1 = arith.constant 0 : i32
    return %c0_i32, %c0_i32_0 : i32, i32
  }
  func.func @transform_3(%arg0: i32) -> (i32, i32) {
    %c0_i32 = arith.constant 0 : i32
    %c0_i32_0 = arith.constant 0 : i32
    return %c0_i32, %arg0 : i32, i32
  }
}

</mosaic_0001>

<bundles_post_ra>
// kernel: squeeze.13
= control target key start
LH: loop header
LB: loop body
LE: loop exit
PB: predicated region body
PF: predicated region fallthrough
CT: control target
= control target key end

     0   :  { %s85_s0 = inlined_call_operand.vmem [shape: f32[16], index: 0, kind: input, shape index: {}]   ;;  %s86_s1 = inlined_call_operand.hbm [shape: f32[2,8,1], index: 1, kind: output, shape index: {}]  }
   0x1   :  { %v5_v0 = vld [vmem:[%s85_s0] sm:$0x1] }
   0x2   :  { %2 = vsyncpa [#allocation1], 0  ;;  %6 = vst [vmem:[#allocation3] sm:$0x1] %v5_v0  ;;  %vm8_vm0 = vcmask 64512   ;;  %s58_s0 = smov 120  }
   0x3   :  { %s59_s8 = smov [#allocation0]  }
   0x4   :  { %s26_s9 = sshll.u32 %s59_s8, 4  ;;  %s27_s9 = int_to_ptr.vmem [resolvable:$true] %s26_s9 }
   0x5   :  { %s34_s10 = scalar_lea.vmem %s27_s9, 32  ;;  %p39_p1 = scmp.lt.s32.totalorder %s27_s9, %s27_s9 }
   0x6   :  { %p35_p0 = scmp.ne.s32.totalorder %s27_s9, %s34_s10  ;;  %p40_p2 = scmp.lt.s32.totalorder %s34_s10, %s34_s10 }
   0x8   :  { %p41_p3 = por %p40_p2, %p39_p1 }
   0x9   :  { %v10_v1 = vld [vmem:[#allocation3] sm:$0x1]  }
   0xa   :  { %v7_v2 = vld [vmem:[#allocation3] sm:$0x1]   ;;  %11 = vrot.lane.b32.xlu0 %v10_v1, %s58_s0  ;;  %p42_p4 = pnand %p41_p3, %p35_p0 }
   0xb   :  { %9 = vst.msk [vmem:[#allocation2] sm:$0x1] %vm8_vm0, %v7_v2  }
  0x7c   :  { %v12_v3 = vpop.permute.xlu0 %11  }
  0x7d   :  { %15 = vst.msk [vmem:[#allocation2 + $0x1] sm:$0x1] %vm8_vm0, %v12_v3  }
  0x84   :  { %v19_v4 = vld [vmem:[#allocation2] sm:$0x3] }
  0x85   :  { %21 = vst [vmem:[#allocation0] sm:$0x3] %v19_v4 }
  0x86   :  { %45 = shalt.err (!%p42_p4)
}
  0x87   :  { %s46_s13 = scalar_lea.hbm %s86_s1, 32 }
  0x88   :  { %p47_p5 = scmp.ne.s32.totalorder %s86_s1, %s46_s13  ;;  %p50_p6 = scmp.lt.u32.totalorder %s46_s13, %s86_s1 }
  0x8a   :  { %p52_p7 = pnand %p50_p6, %p47_p5 }
  0x8c   :  { %55 = shalt.err (!%p52_p7)
}
  0x8d   :  { %29 = dma.vmem_to_hbm [thread:$0]  %s27_s9, 32, %s86_s1, [#allocation1]  }
  0x8e   :  { %56 = dma.done.wait [#allocation1], 32  }
  0x8f   :  { %57 = vsyncadd [#allocation1], 4294967264 }
  0x90   :  { %31 = vsyncpa [#allocation1], 1 }

// kernel: field_forward.1
= control target key start
LH: loop header
LB: loop body
LE: loop exit
PB: predicated region body
PF: predicated region fallthrough
CT: control target
= control target key end

     0   :  { %vm120_vm0 = vcmask 1042432   ;;  %vm107_vm1 = vcmask 48128   ;;  %v555_v1 = vmov 0   ;;  %vm225_vm2 = vcmask 261120   ;;  %s670_s0 = inlined_call_operand.vmem [shape: bf16[6,128], index: 0, kind: input, shape index: {}]   ;;  %s671_s1 = inlined_call_operand.vmem [shape: bf16[144,32], index: 1, kind: input, shape index: {}]   ;;  %s672_s2 = inlined_call_operand.vmem [shape: f32[104,1], index: 2, kind: input, shape index: {}]   ;;  %s673_s3 = inlined_call_operand.vmem [shape: f32[4,128], index: 3, kind: output, shape index: {}]  }
   0x1   :  { %v15_v0 = vld [vmem:[%s670_s0] sm:$0x7]  ;;  %536 = vset.pattern.permute.xlu0 %v555_v1  ;;  %537 = vset.pattern.permute.xlu1 %v555_v1  ;;  %v539_v4 = vld [vmem:[%s671_s1 + $0x8] sm:$0xff]   ;;  %v540_v5 = vld [vmem:[%s671_s1 + $0x10] sm:$0xff]   ;;  %v556_v44 = vmov 0.0   ;;  %vm557_vm3 = vmmov 0  }
   0x2   :  { %532 = vmatprep.subr.msk.bf16.mxu0 %vm120_vm0, %v15_v0  ;;  %v122_v2 = vsel %vm120_vm0, %v15_v0, 0  ;;  %v538_v3 = vld [vmem:[%s671_s1] sm:$0xff]   ;;  %v36_v7 = vld [vmem:[%s672_s2 + $0x10] sm:$0xff]  ;;  %v35_v8 = vld [vmem:[%s672_s2 + $0x8] sm:$0xff]  ;;  %508 = vmatprep.subr.bf16.mxu1 %v556_v44 }
   0x3   :  { %491 = vmatpush3.bf16.msra.mxu0 %v122_v2  ;;  %492 = vmatprep.mubr.msk.bf16.mxu0 %vm107_vm1, %v538_v3  ;;  %v34_v6 = vld [vmem:[%s672_s2] sm:$0xff]  ;;  %v37_v9 = vld [vmem:[%s672_s2 + $0x18] sm:$0xff]  ;;  %v43_v12 = vld [vmem:[%s672_s2 + $0x48] sm:$0xff] }
   0x4   :  { %49 = vperm.xlu0 %536, %v34_v6   ;;  %59 = vperm.xlu1 %537, %v36_v7   ;;  %v541_v10 = vld [vmem:[%s671_s1 + $0x18] sm:$0xff]   ;;  %v42_v11 = vld [vmem:[%s672_s2 + $0x40] sm:$0xff]  ;;  %v44_v13 = vld [vmem:[%s672_s2 + $0x50] sm:$0xff] }
   0x5   :  { %v45_v14 = vld [vmem:[%s672_s2 + $0x58] sm:$0xff]  ;;  %v38_v15 = vld [vmem:[%s672_s2 + $0x20] sm:$0xff]  ;;  %v39_v16 = vld [vmem:[%s672_s2 + $0x28] sm:$0xff]  ;;  %512 = vmatprep.mubr.msk.bf16.mxu1 %vm557_vm3, %v556_v44 }
   0x6   :  { %493 = vmatmul.mubr.msk.bf16.vlgmr.msra.gmra.mrb[0].mxu0 %vm107_vm1, %v539_v4  ;;  %v40_v17 = vld [vmem:[%s672_s2 + $0x30] sm:$0xff]  ;;  %v41_v18 = vld [vmem:[%s672_s2 + $0x38] sm:$0xff]  ;;  %v46_v19 = vld [vmem:[%s672_s2 + $0x60] sm:$0xff] }
   0x7   :  { %496 = vmatprep.mubr.msk.bf16.mxu0 %vm107_vm1, %v540_v5  ;;  %v542_v20 = vld [vmem:[%s671_s1 + $0x20] sm:$0xff]   ;;  %v543_v43 = vld [vmem:[%s671_s1 + $0x28] sm:$0xff]   ;;  %v544_v63 = vld [vmem:[%s671_s1 + $0x30] sm:$0xff]  }
   0x8   :  { %54 = vperm.xlu0 %536, %v35_v8   ;;  %64 = vperm.xlu1 %537, %v37_v9   ;;  %v545_v0 = vld [vmem:[%s671_s1 + $0x38] sm:$0xff]   ;;  %v546_v1 = vld [vmem:[%s671_s1 + $0x40] ss:$0 sps:$4 sm:$0xff]  }
   0xc   :  { %197 = vperm.xlu0 %536, %v42_v11   ;;  %202 = vperm.xlu1 %537, %v43_v12  }
   0xe   :  { %497 = vmatmul.mubr.msk.bf16.gmra.mrb[4].mxu0 %vm107_vm1, %v541_v10 }
   0xf   :  { %504 = vmatprep.mubr.msk.bf16.mxu0 %vm225_vm2, %v542_v20 }
  0x10   :  { %207 = vperm.xlu0 %536, %v44_v13   ;;  %212 = vperm.xlu1 %537, %v45_v14  }
  0x14   :  { %69 = vperm.xlu0 %536, %v38_v15   ;;  %74 = vperm.xlu1 %537, %v39_v16  }
  0x18   :  { %79 = vperm.xlu0 %536, %v40_v17   ;;  %84 = vperm.xlu1 %537, %v41_v18  }
  0x1c   :  { %367 = vperm.xlu0 %536, %v46_v19  }
  0x83   :  { %v60_v21 = vpop.permute.xlu1 %59  ;;  %v50_v22 = vpop.permute.xlu0 %49 }
  0x87   :  { %v65_v26 = vpop.permute.xlu1 %64  ;;  %v55_v29 = vpop.permute.xlu0 %54 }
  0x8b   :  { %v198_v45 = vpop.permute.xlu0 %197  ;;  %v203_v46 = vpop.permute.xlu1 %202 }
  0x8f   :  { %v208_v47 = vpop.permute.xlu0 %207  ;;  %v213_v51 = vpop.permute.xlu1 %212 }
  0x93   :  { %v70_v2 = vpop.permute.xlu0 %69  ;;  %v75_v4 = vpop.permute.xlu1 %74 }
  0x97   :  { %v80_v14 = vpop.permute.xlu0 %79  ;;  %v85_v17 = vpop.permute.xlu1 %84 }
  0xd9   :  { %v494_v23 = vpop.f32.mrb[0].mxu0 }
  0xda   :  { %v167_v24 = vadd.f32 %v494_v23, %v60_v21  ;;  %v158_v25 = vpop.f32.mrb[1].mxu0 }
  0xdb   :  { %v159_v27 = vadd.f32 %v158_v25, %v50_v22  ;;  %v495_v28 = vpop.f32.mrb[2].mxu0 }
  0xdc   :  { %v170_v30 = vadd.f32 %v495_v28, %v65_v26  ;;  %v161_v31 = vpop.f32.mrb[3].mxu0  ;;  %v191_v33 = vmax.f32 %v167_v24, 0.0  ;;  %v368_v28 = vpop.permute.xlu0 %367 }
  0xdd   :  { %v162_v32 = vadd.f32 %v161_v31, %v55_v29  ;;  %v189_v35 = vmax.f32 %v159_v27, 0.0  ;;  %v33_v31 = vld [vmem:[%s671_s1 + $0x44] sm:$0xf] }
  0xde   :  { %v192_v34 = vmax.f32 %v170_v30, 0.0 }
  0xdf   :  { %v190_v36 = vmax.f32 %v162_v32, 0.0 }
  0xe0   :  { %v194_v37 = vpack.c.bf16 %v192_v34, %v191_v33 }
  0xe1   :  { %v193_v38 = vpack.c.bf16 %v190_v36, %v189_v35  ;;  %v498_v39 = vpop.f32.mrb[4].mxu0 }
  0xe2   :  { %v174_v40 = vpop.f32.mrb[5].mxu0  ;;  %v183_v15 = vadd.f32 %v498_v39, %v80_v14 }
  0xe3   :  { %v499_v41 = vpop.f32.mrb[6].mxu0  ;;  %500 = vmatprep.subr.bf16.mxu0 %v193_v38  ;;  %v175_v3 = vadd.f32 %v174_v40, %v70_v2 }
  0xe4   :  { %v177_v42 = vpop.f32.mrb[7].mxu0  ;;  %501 = vmatpush3.bf16.msra.mxu0 %v193_v38  ;;  %v186_v19 = vadd.f32 %v499_v41, %v85_v17 }
  0xe5   :  { %502 = vmatprep.subr.bf16.mxu0 %v194_v37  ;;  %v178_v6 = vadd.f32 %v177_v42, %v75_v4 }
  0xe8   :  { %503 = vmatpush3.bf16.msra.mxu0 %v194_v37 }
  0xe9   :  { %524 = vmatprep.subr.bf16.mxu0 %v556_v44 }
  0xeb   :  { %505 = vmatmul.mubr.msk.bf16.vlgmr.msra.gmra.mrb[8].mxu0 %vm225_vm2, %v543_v43 }
  0xec   :  { %528 = vmatprep.mubr.msk.bf16.mxu0 %vm557_vm3, %v556_v44 }
 0x1be   :  { %v506_v48 = vpop.f32.mrb[8].mxu0 }
 0x1bf   :  { %v275_v49 = vadd.f32 %v506_v48, %v208_v47  ;;  %v266_v50 = vpop.f32.mrb[9].mxu0 }
 0x1c0   :  { %v267_v52 = vadd.f32 %v266_v50, %v198_v45  ;;  %v507_v53 = vpop.f32.mrb[10].mxu0 }
 0x1c1   :  { %v278_v54 = vadd.f32 %v507_v53, %v213_v51  ;;  %v269_v55 = vpop.f32.mrb[11].mxu0  ;;  %v283_v57 = vmax.f32 %v275_v49, 0.0  ;;  %v424_v49 = vrot.slane %v368_v28, 1 }
 0x1c2   :  { %v270_v56 = vadd.f32 %v269_v55, %v203_v46  ;;  %v281_v59 = vmax.f32 %v267_v52, 0.0 }
 0x1c3   :  { %v284_v58 = vmax.f32 %v278_v54, 0.0 }
 0x1c4   :  { %v282_v60 = vmax.f32 %v270_v56, 0.0 }
 0x1c5   :  { %v286_v61 = vpack.c.bf16 %v284_v58, %v283_v57 }
 0x1c6   :  { %v285_v62 = vpack.c.bf16 %v282_v60, %v281_v59 }
 0x1c8   :  { %509 = vmatpush3.bf16.msra.mxu1 %v285_v62 }
 0x1c9   :  { %510 = vmatprep.subr.bf16.mxu1 %v556_v44 }
 0x1cc   :  { %511 = vmatpush3.bf16.msra.mxu1 %v286_v61 }
 0x1cf   :  { %513 = vmatmul.mubr.msk.bf16.vlgmr.msra.gmra.mrb[0].mxu1 %vm225_vm2, %v544_v63 }
 0x1d0   :  { %516 = vmatprep.mubr.msk.bf16.mxu1 %vm557_vm3, %v556_v44 }
 0x1d7   :  { %517 = vmatmul.mubr.msk.bf16.gmra.mrb[4].mxu1 %vm225_vm2, %v545_v0 }
 0x1d8   :  { %520 = vmatprep.mubr.msk.bf16.mxu1 %vm557_vm3, %v556_v44 }
 0x1df   :  { %521 = vmatmul.mubr.msk.bf16.gmra.mrb[8].mxu1 %vm225_vm2, %v546_v1 }
 0x2a2   :  { %v343_v5 = vpop.f32.mrb[0].mxu1 }
 0x2a3   :  { %v371_v7 = vadd.f32 %v343_v5, %v175_v3  ;;  %v514_v8 = vpop.f32.mrb[1].mxu1 }
 0x2a4   :  { %v346_v9 = vpop.f32.mrb[2].mxu1 }
 0x2a5   :  { %v372_v10 = vadd.f32 %v346_v9, %v178_v6  ;;  %v515_v11 = vpop.f32.mrb[3].mxu1  ;;  %v375_v12 = vmax.f32 %v371_v7, 0.0 }
 0x2a7   :  { %v376_v13 = vmax.f32 %v372_v10, 0.0 }
 0x2a9   :  { %v379_v16 = vpack.c.bf16 %v376_v13, %v375_v12 }
 0x2aa   :  { %v351_v18 = vpop.f32.mrb[4].mxu1 }
 0x2ab   :  { %v373_v20 = vadd.f32 %v351_v18, %v183_v15  ;;  %v518_v21 = vpop.f32.mrb[5].mxu1  ;;  %525 = vmatpush3.bf16.msra.mxu0 %v379_v16 }
 0x2ac   :  { %v354_v22 = vpop.f32.mrb[6].mxu1  ;;  %526 = vmatprep.subr.bf16.mxu0 %v556_v44 }
 0x2ad   :  { %v374_v23 = vadd.f32 %v354_v22, %v186_v19  ;;  %v519_v24 = vpop.f32.mrb[7].mxu1  ;;  %v377_v25 = vmax.f32 %v373_v20, 0.0 }
 0x2af   :  { %v378_v26 = vmax.f32 %v374_v23, 0.0 }
 0x2b1   :  { %v380_v27 = vpack.c.bf16 %v378_v26, %v377_v25 }
 0x2b2   :  { %v359_v29 = vpop.f32.mrb[8].mxu1 }
 0x2b3   :  { %v370_v30 = vadd.f32 %v368_v28, %v359_v29  ;;  %527 = vmatpush3.bf16.msra.mxu0 %v380_v27  ;;  %v522_v32 = vpop.f32.mrb[9].mxu1 }
 0x2b4   :  { %v362_v33 = vpop.f32.mrb[10].mxu1 }
 0x2b5   :  { %v428_v34 = vand.u32 2147483647, %v370_v30  ;;  %v523_v35 = vpop.f32.mrb[11].mxu1  ;;  %v427_v46 = vmax.f32 %v370_v30, 0.0 }
 0x2b6   :  { %529 = vmatmul.mubr.msk.bf16.vlgmr.msra.gmra.mrb[12].mxu0 %vm225_vm2, %v33_v31 }
 0x2b7   :  { %v429_v36 = vsub.f32 0.0, %v428_v34 }
 0x2b9   :  { %v430_v37 = vmul.f32 1.442695, %v429_v36 }
 0x2bb   :  { %547 = vpow2.f32 %v430_v37 }
 0x2c5   :  { %v548_v38 = vpop.eup %547 }
 0x2c6   :  { %v432_v39 = vadd.f32 1.0, %v548_v38  ;;  %v435_v40 = vmul.f32 -0.5, %v548_v38  ;;  %v438_v42 = vand.u32 2147483647, %v548_v38 }
 0x2c8   :  { %549 = vlog2.f32 %v432_v39  ;;  %v436_v41 = vadd.f32 1.0, %v435_v40  ;;  %vm439_vm4 = vcmp.lt.f32.partialorder %v438_v42, 0.0004427343 }
 0x2ca   :  { %v437_v45 = vmul.f32 %v548_v38, %v436_v41 }
 0x2d2   :  { %v550_v43 = vpop.eup %549 }
 0x2d3   :  { %v434_v44 = vmul.f32 0.6931472, %v550_v43 }
 0x2d5   :  { %v440_v47 = vsel %vm439_vm4, %v437_v45, %v434_v44 }
 0x2d6   :  { %v441_v48 = vadd.f32 %v440_v47, %v427_v46 }
 0x2d8   :  { %442 = vst [vmem:[%s673_s3] sm:$0x1] %v441_v48 }
 0x389   :  { %v418_v50 = vpop.f32.mrb[12].mxu0 }
 0x38a   :  { %v426_v51 = vadd.f32 %v424_v49, %v418_v50  ;;  %v530_v52 = vpop.f32.mrb[13].mxu0 }
 0x38b   :  { %v421_v53 = vpop.f32.mrb[14].mxu0 }
 0x38c   :  { %v443_v54 = vsub.f32 0.0, %v426_v51  ;;  %v531_v55 = vpop.f32.mrb[15].mxu0 }
 0x38e   :  { %v444_v56 = vmul.f32 1.442695, %v443_v54 }
 0x390   :  { %551 = vpow2.f32 %v444_v56 }
 0x39a   :  { %v552_v57 = vpop.eup %551 }
 0x39b   :  { %v446_v58 = vadd.f32 1.0, %v552_v57 }
 0x39d   :  { %553 = vrcp.f32 %v446_v58 }
 0x3a7   :  { %v554_v59 = vpop.eup %553 }
 0x3a8   :  { %449 = vst [vmem:[%s673_s3 + $0x1] sm:$0x7] %v554_v59 }

</bundles_post_ra>
